<compile_context>
chip_gen: v5e
topology: v5e:2x2
jax: 0.10.0
libtpu: 0.0.40
codegen_flags: <defaults>
</compile_context>

<pallas_src>
import functools

import jax
import jax.numpy as jnp
from jax import lax
from jax.experimental import pallas as pl
from jax.experimental.pallas import tpu as pltpu


def bilstm_fc_kernel(emb_ref, wx_ref, wh_ref, b_ref, fcw_ref, fcb_ref,
                     out_ref, gx_ref, *, seq, batch):
    """Bidirectional single-layer LSTM over the full sequence + final Linear.

    Gate-column layout everywhere is [i_f i_b f_f f_b g_f g_b o_f o_b] (each block H wide),
    and the packed state layout is [fwd | bwd], so one dot per step serves both directions.
    PyTorch gate order (i, f, g, o) is preserved per direction.
    """
    H2 = wh_ref.shape[0]          # 2 * hidden
    H = H2 // 2
    G = wh_ref.shape[1]           # 8 * hidden

    # ---- Prologue: every timestep's input projection (both directions) in a single
    # MXU matmul, off the recurrence critical path. Bias is fused in here once. ----
    gx = (jnp.dot(emb_ref[...], wx_ref[...], preferred_element_type=jnp.float32)
          + b_ref[...])                                        # (seq*batch, 8H)

    # Forward-direction gate lanes of the interleaved layout.
    col = lax.broadcasted_iota(jnp.int32, (1, G), 1)
    fwd_mask = (col % H2) < H                                  # hoisted out of the loop

    # Build per-step combined slabs: forward lanes from time t, backward lanes from
    # time seq-1-t, so the recurrence body needs exactly one slab load per step.
    for s in range(seq):
        slab_f = gx[s * batch:(s + 1) * batch, :]
        slab_b = gx[(seq - 1 - s) * batch:(seq - s) * batch, :]
        gx_ref[s] = jnp.where(fwd_mask, slab_f, slab_b)

    wh = wh_ref[...]                                           # (2H, 8H) block-diagonal

    # ---- Recurrence: fully unrolled (the review's "fully unroll" option; seq is small
    # and static). h/c live in vregs as carried values -> no VMEM store/load per step,
    # and the independent fwd/bwd work + EUP/MXU ops can interleave freely. ----
    h = jnp.zeros((batch, H2), jnp.float32)                    # [h_fwd | h_bwd]
    c = jnp.zeros((batch, H2), jnp.float32)                    # [c_fwd | c_bwd]
    for t in range(seq):
        gates = gx_ref[t] + jnp.dot(h, wh, preferred_element_type=jnp.float32)  # (B, 8H)
        sg = jax.nn.sigmoid(gates)                             # full-width EUP pass
        th = jnp.tanh(gates)                                   # full-width EUP pass
        i = sg[:, 0:H2]                                        # [i_f | i_b]
        f = sg[:, H2:2 * H2]                                   # [f_f | f_b]
        g = th[:, 2 * H2:3 * H2]                               # [g_f | g_b]
        o = sg[:, 3 * H2:4 * H2]                               # [o_f | o_b]
        c = f * c + i * g
        h = o * jnp.tanh(c)

    # cat((hidden[-2], hidden[-1]), dim=1) is already contiguous in h = [h_fwd | h_bwd].
    # Output is lane-padded to 128 so the store is lane-dense; the wrapper slices it.
    out_ref[...] = (jnp.dot(h, fcw_ref[...], preferred_element_type=jnp.float32)
                    + fcb_ref[...])


def _interleave_gates(wf, wb, hidden):
    """Columns [i f g o] of each direction -> [i_f i_b f_f f_b g_f g_b o_f o_b]."""
    r = wf.shape[0]
    return jnp.stack(
        [wf.reshape(r, 4, hidden), wb.reshape(r, 4, hidden)], axis=2
    ).reshape(r, 8 * hidden)


@jax.jit
def rnn_model_forward(text, params):
    """Full RNNModel forward. Embedding gather is XLA glue; the LSTM recurrence + FC
    hot path runs inside the Pallas kernel. Dropout is identity (eval mode)."""
    embedded = jnp.take(params["embed"], text, axis=0)          # (seq, batch, E)
    seq, batch, embed_dim = embedded.shape
    hidden = params["whh_f"].shape[0]
    out_dim = params["fc_w"].shape[1]
    out_pad = 128                                               # lane-dense output store

    # One-time weight plumbing (not on the hot path):
    #  * fused (E, 8H) input-projection matrix + fused (1, 8H) bias for both directions
    #  * block-diagonal (2H, 8H) recurrent matrix so ONE dot per step updates the packed
    #    state [h_fwd | h_bwd]
    wx_all = _interleave_gates(params["wih_f"], params["wih_b"], hidden)
    b_all = _interleave_gates(params["b_f"], params["b_b"], hidden)
    zeros_h = jnp.zeros_like(params["whh_f"])
    wh_blk = jnp.concatenate([
        _interleave_gates(params["whh_f"], zeros_h, hidden),    # rows driven by h_fwd
        _interleave_gates(zeros_h, params["whh_b"], hidden),    # rows driven by h_bwd
    ], axis=0)                                                  # (2H, 8H)
    fcw_pad = jnp.zeros((2 * hidden, out_pad), jnp.float32).at[:, :out_dim].set(params["fc_w"])
    fcb_pad = jnp.zeros((1, out_pad), jnp.float32).at[:, :out_dim].set(params["fc_b"])

    emb2d = embedded.reshape(seq * batch, embed_dim)            # (seq*batch, E)

    vmem = pl.BlockSpec(memory_space=pltpu.MemorySpace.VMEM)
    out = pl.pallas_call(
        functools.partial(bilstm_fc_kernel, seq=seq, batch=batch),
        out_shape=jax.ShapeDtypeStruct((batch, out_pad), jnp.float32),
        in_specs=[vmem] * 6,
        out_specs=vmem,
        scratch_shapes=[pltpu.VMEM((seq, batch, 8 * hidden), jnp.float32)],
    )(emb2d, wx_all, wh_blk, b_all, fcw_pad, fcb_pad)
    # TODO(synk): at larger seq/embed/batch, tile the sequence with a grid axis marked
    # 'arbitrary' + chunked BlockSpecs (sized for v7x's 64 MiB VMEM) and optionally split
    # fwd/bwd across the two v7x TensorCores; unnecessary at these toy shapes.
    return out[:, :out_dim]


def make_params(key, vocab_size, embed_dim, hidden_size, output_dim):
    ks = jax.random.split(key, 10)
    s = 0.1
    # weights stored pre-transposed for  x @ W  layout; biases = b_ih + b_hh fused
    return {
        "embed": jax.random.normal(ks[0], (vocab_size, embed_dim), jnp.float32) * s,
        "wih_f": jax.random.normal(ks[1], (embed_dim, 4 * hidden_size), jnp.float32) * s,
        "whh_f": jax.random.normal(ks[2], (hidden_size, 4 * hidden_size), jnp.float32) * s,
        "b_f":   jax.random.normal(ks[3], (1, 4 * hidden_size), jnp.float32) * s,
        "wih_b": jax.random.normal(ks[4], (embed_dim, 4 * hidden_size), jnp.float32) * s,
        "whh_b": jax.random.normal(ks[5], (hidden_size, 4 * hidden_size), jnp.float32) * s,
        "b_b":   jax.random.normal(ks[6], (1, 4 * hidden_size), jnp.float32) * s,
        "fc_w":  jax.random.normal(ks[7], (2 * hidden_size, output_dim), jnp.float32) * s,
        "fc_b":  jax.random.normal(ks[8], (1, output_dim), jnp.float32) * s,
    }


def reference_forward(text, params):
    """Pure-JAX reference for correctness checking."""
    emb = jnp.take(params["embed"], text, axis=0)
    batch = emb.shape[1]
    H = params["whh_f"].shape[0]

    def step(carry, x_t, wih, whh, b):
        h, c = carry
        gates = x_t @ wih + h @ whh + b
        i = jax.nn.sigmoid(gates[:, 0:H])
        f = jax.nn.sigmoid(gates[:, H:2 * H])
        g = jnp.tanh(gates[:, 2 * H:3 * H])
        o = jax.nn.sigmoid(gates[:, 3 * H:4 * H])
        c = f * c + i * g
        h = o * jnp.tanh(c)
        return (h, c), None

    init = (jnp.zeros((batch, H), jnp.float32), jnp.zeros((batch, H), jnp.float32))
    (hf, _), _ = lax.scan(lambda cr, x: step(cr, x, params["wih_f"], params["whh_f"], params["b_f"]),
                          init, emb)
    (hb, _), _ = lax.scan(lambda cr, x: step(cr, x, params["wih_b"], params["whh_b"], params["b_b"]),
                          init, emb[::-1])
    h_cat = jnp.concatenate([hf, hb], axis=1)
    return h_cat @ params["fc_w"] + params["fc_b"]


if __name__ == "__main__":
    vocab_size, embed_dim, hidden_size, output_dim = 50, 32, 32, 4
    seq_len, batch = 8, 4

    key = jax.random.PRNGKey(0)
    k_params, k_text = jax.random.split(key)
    params = make_params(k_params, vocab_size, embed_dim, hidden_size, output_dim)
    text = jax.random.randint(k_text, (seq_len, batch), 0, vocab_size, dtype=jnp.int32)

    out = rnn_model_forward(text, params)
    out = jax.block_until_ready(out)

    ref = reference_forward(text, params)
    assert out.shape == (batch, output_dim)
    assert jnp.allclose(out, ref, atol=1e-4, rtol=1e-4)
    print("KERNEL_OK")
</pallas_src>

<mosaic_0001>
module attributes {stable_mosaic.version = 11 : i64} {
  func.func @bilstm_fc_kernel(%arg0: memref<32x32xf32, #tpu.memory_space<vmem>>, %arg1: memref<32x256xf32, #tpu.memory_space<vmem>>, %arg2: memref<64x256xf32, #tpu.memory_space<vmem>>, %arg3: memref<1x256xf32, #tpu.memory_space<vmem>>, %arg4: memref<64x128xf32, #tpu.memory_space<vmem>>, %arg5: memref<1x128xf32, #tpu.memory_space<vmem>>, %arg6: memref<4x128xf32, #tpu.memory_space<vmem>>, %arg7: memref<8x4x256xf32, #tpu.memory_space<vmem>>) attributes {dimension_semantics = [], scalar_prefetch = 0 : i64, scratch_operands = 1 : i64, tpu.core_type = #tpu.core_type<tc>} {
    %c0 = arith.constant 0 : index
    %c0_0 = arith.constant 0 : index
    %0 = vector.load %arg0[%c0, %c0_0] : memref<32x32xf32, #tpu.memory_space<vmem>>, vector<32x32xf32>
    %c0_1 = arith.constant 0 : index
    %c0_2 = arith.constant 0 : index
    %1 = vector.load %arg1[%c0_1, %c0_2] : memref<32x256xf32, #tpu.memory_space<vmem>>, vector<32x256xf32>
    %cst = arith.constant dense<0.000000e+00> : vector<32x256xf32>
    %2 = tpu.matmul %0, %1, %cst {dimension_numbers = #tpu.dot_dimension_numbers<[1], [0], [0], [1], [0, 0, 1, 1], [], []>} : vector<32x32xf32>, vector<32x256xf32>, vector<32x256xf32> -> vector<32x256xf32>
    %c0_3 = arith.constant 0 : index
    %c0_4 = arith.constant 0 : index
    %3 = vector.load %arg3[%c0_3, %c0_4] : memref<1x256xf32, #tpu.memory_space<vmem>>, vector<1x256xf32>
    %4 = vector.broadcast %3 : vector<1x256xf32> to vector<32x256xf32>
    %5 = arith.addf %2, %4 : vector<32x256xf32>
    %6 = tpu.iota {dimensions = array<i32: 1>} : vector<1x256xi32>
    %c64_i32 = arith.constant 64 : i32
    %c0_i32 = arith.constant 0 : i32
    %7 = arith.cmpi eq, %c64_i32, %c0_i32 : i32
    %c1_i32 = arith.constant 1 : i32
    %8 = arith.select %7, %c1_i32, %c64_i32 : i32
    %9 = vector.broadcast %8 : i32 to vector<1x256xi32>
    %10 = arith.remsi %6, %9 : vector<1x256xi32>
    %c0_i32_5 = arith.constant 0 : i32
    %11 = vector.broadcast %c0_i32_5 : i32 to vector<1x256xi32>
    %12 = arith.cmpi ne, %10, %11 : vector<1x256xi32>
    %c0_i32_6 = arith.constant 0 : i32
    %13 = vector.broadcast %c0_i32_6 : i32 to vector<1x256xi32>
    %14 = arith.cmpi slt, %10, %13 : vector<1x256xi32>
    %c0_i32_7 = arith.constant 0 : i32
    %15 = arith.cmpi slt, %8, %c0_i32_7 : i32
    %16 = vector.broadcast %15 : i1 to vector<1x256xi1>
    %17 = vector.broadcast %16 : vector<1x256xi1> to vector<1x256xi1>
    %18 = arith.xori %14, %17 : vector<1x256xi1>
    %19 = arith.andi %18, %12 : vector<1x256xi1>
    %20 = vector.broadcast %8 : i32 to vector<1x256xi32>
    %21 = arith.addi %10, %20 : vector<1x256xi32>
    %22 = arith.select %19, %21, %10 : vector<1x256xi1>, vector<1x256xi32>
    %c32_i32 = arith.constant 32 : i32
    %23 = vector.broadcast %c32_i32 : i32 to vector<1x256xi32>
    %24 = arith.cmpi slt, %22, %23 : vector<1x256xi32>
    %25 = vector.extract_strided_slice %5 {offsets = [0, 0], sizes = [4, 256], strides = [1, 1]} : vector<32x256xf32> to vector<4x256xf32>
    %26 = vector.extract_strided_slice %5 {offsets = [28, 0], sizes = [4, 256], strides = [1, 1]} : vector<32x256xf32> to vector<4x256xf32>
    %27 = vector.shape_cast %24 : vector<1x256xi1> to vector<1x256xi1>
    %28 = vector.broadcast %27 : vector<1x256xi1> to vector<4x256xi1>
    %29 = arith.select %28, %25, %26 : vector<4x256xi1>, vector<4x256xf32>
    %c0_8 = arith.constant 0 : index
    %c0_9 = arith.constant 0 : index
    %c0_10 = arith.constant 0 : index
    %30 = vector.load %arg7[%c0_8, %c0_9, %c0_10] : memref<8x4x256xf32, #tpu.memory_space<vmem>>, vector<1x4x256xf32>
    %31 = vector.shape_cast %30 : vector<1x4x256xf32> to vector<4x256xf32>
    %32 = vector.shape_cast %29 : vector<4x256xf32> to vector<1x4x256xf32>
    tpu.vector_store %arg7[%c0_8, %c0_9, %c0_10], %32 {strides = array<i32>} : memref<8x4x256xf32, #tpu.memory_space<vmem>>, vector<1x4x256xf32>,
    %33 = vector.extract_strided_slice %5 {offsets = [4, 0], sizes = [4, 256], strides = [1, 1]} : vector<32x256xf32> to vector<4x256xf32>
    %34 = vector.extract_strided_slice %5 {offsets = [24, 0], sizes = [4, 256], strides = [1, 1]} : vector<32x256xf32> to vector<4x256xf32>
    %35 = vector.shape_cast %24 : vector<1x256xi1> to vector<1x256xi1>
    %36 = vector.broadcast %35 : vector<1x256xi1> to vector<4x256xi1>
    %37 = arith.select %36, %33, %34 : vector<4x256xi1>, vector<4x256xf32>
    %c1 = arith.constant 1 : index
    %c0_11 = arith.constant 0 : index
    %c0_12 = arith.constant 0 : index
    %38 = vector.load %arg7[%c1, %c0_11, %c0_12] : memref<8x4x256xf32, #tpu.memory_space<vmem>>, vector<1x4x256xf32>
    %39 = vector.shape_cast %38 : vector<1x4x256xf32> to vector<4x256xf32>
    %40 = vector.shape_cast %37 : vector<4x256xf32> to vector<1x4x256xf32>
    tpu.vector_store %arg7[%c1, %c0_11, %c0_12], %40 {strides = array<i32>} : memref<8x4x256xf32, #tpu.memory_space<vmem>>, vector<1x4x256xf32>,
    %41 = vector.extract_strided_slice %5 {offsets = [8, 0], sizes = [4, 256], strides = [1, 1]} : vector<32x256xf32> to vector<4x256xf32>
    %42 = vector.extract_strided_slice %5 {offsets = [20, 0], sizes = [4, 256], strides = [1, 1]} : vector<32x256xf32> to vector<4x256xf32>
    %43 = vector.shape_cast %24 : vector<1x256xi1> to vector<1x256xi1>
    %44 = vector.broadcast %43 : vector<1x256xi1> to vector<4x256xi1>
    %45 = arith.select %44, %41, %42 : vector<4x256xi1>, vector<4x256xf32>
    %c2 = arith.constant 2 : index
    %c0_13 = arith.constant 0 : index
    %c0_14 = arith.constant 0 : index
    %46 = vector.load %arg7[%c2, %c0_13, %c0_14] : memref<8x4x256xf32, #tpu.memory_space<vmem>>, vector<1x4x256xf32>
    %47 = vector.shape_cast %46 : vector<1x4x256xf32> to vector<4x256xf32>
    %48 = vector.shape_cast %45 : vector<4x256xf32> to vector<1x4x256xf32>
    tpu.vector_store %arg7[%c2, %c0_13, %c0_14], %48 {strides = array<i32>} : memref<8x4x256xf32, #tpu.memory_space<vmem>>, vector<1x4x256xf32>,
    %49 = vector.extract_strided_slice %5 {offsets = [12, 0], sizes = [4, 256], strides = [1, 1]} : vector<32x256xf32> to vector<4x256xf32>
    %50 = vector.extract_strided_slice %5 {offsets = [16, 0], sizes = [4, 256], strides = [1, 1]} : vector<32x256xf32> to vector<4x256xf32>
    %51 = vector.shape_cast %24 : vector<1x256xi1> to vector<1x256xi1>
    %52 = vector.broadcast %51 : vector<1x256xi1> to vector<4x256xi1>
    %53 = arith.select %52, %49, %50 : vector<4x256xi1>, vector<4x256xf32>
    %c3 = arith.constant 3 : index
    %c0_15 = arith.constant 0 : index
    %c0_16 = arith.constant 0 : index
    %54 = vector.load %arg7[%c3, %c0_15, %c0_16] : memref<8x4x256xf32, #tpu.memory_space<vmem>>, vector<1x4x256xf32>
    %55 = vector.shape_cast %54 : vector<1x4x256xf32> to vector<4x256xf32>
    %56 = vector.shape_cast %53 : vector<4x256xf32> to vector<1x4x256xf32>
    tpu.vector_store %arg7[%c3, %c0_15, %c0_16], %56 {strides = array<i32>} : memref<8x4x256xf32, #tpu.memory_space<vmem>>, vector<1x4x256xf32>,
    %57 = vector.extract_strided_slice %5 {offsets = [16, 0], sizes = [4, 256], strides = [1, 1]} : vector<32x256xf32> to vector<4x256xf32>
    %58 = vector.extract_strided_slice %5 {offsets = [12, 0], sizes = [4, 256], strides = [1, 1]} : vector<32x256xf32> to vector<4x256xf32>
    %59 = vector.shape_cast %24 : vector<1x256xi1> to vector<1x256xi1>
    %60 = vector.broadcast %59 : vector<1x256xi1> to vector<4x256xi1>
    %61 = arith.select %60, %57, %58 : vector<4x256xi1>, vector<4x256xf32>
    %c4 = arith.constant 4 : index
    %c0_17 = arith.constant 0 : index
    %c0_18 = arith.constant 0 : index
    %62 = vector.load %arg7[%c4, %c0_17, %c0_18] : memref<8x4x256xf32, #tpu.memory_space<vmem>>, vector<1x4x256xf32>
    %63 = vector.shape_cast %62 : vector<1x4x256xf32> to vector<4x256xf32>
    %64 = vector.shape_cast %61 : vector<4x256xf32> to vector<1x4x256xf32>
    tpu.vector_store %arg7[%c4, %c0_17, %c0_18], %64 {strides = array<i32>} : memref<8x4x256xf32, #tpu.memory_space<vmem>>, vector<1x4x256xf32>,
    %65 = vector.extract_strided_slice %5 {offsets = [20, 0], sizes = [4, 256], strides = [1, 1]} : vector<32x256xf32> to vector<4x256xf32>
    %66 = vector.extract_strided_slice %5 {offsets = [8, 0], sizes = [4, 256], strides = [1, 1]} : vector<32x256xf32> to vector<4x256xf32>
    %67 = vector.shape_cast %24 : vector<1x256xi1> to vector<1x256xi1>
    %68 = vector.broadcast %67 : vector<1x256xi1> to vector<4x256xi1>
    %69 = arith.select %68, %65, %66 : vector<4x256xi1>, vector<4x256xf32>
    %c5 = arith.constant 5 : index
    %c0_19 = arith.constant 0 : index
    %c0_20 = arith.constant 0 : index
    %70 = vector.load %arg7[%c5, %c0_19, %c0_20] : memref<8x4x256xf32, #tpu.memory_space<vmem>>, vector<1x4x256xf32>
    %71 = vector.shape_cast %70 : vector<1x4x256xf32> to vector<4x256xf32>
    %72 = vector.shape_cast %69 : vector<4x256xf32> to vector<1x4x256xf32>
    tpu.vector_store %arg7[%c5, %c0_19, %c0_20], %72 {strides = array<i32>} : memref<8x4x256xf32, #tpu.memory_space<vmem>>, vector<1x4x256xf32>,
    %73 = vector.extract_strided_slice %5 {offsets = [24, 0], sizes = [4, 256], strides = [1, 1]} : vector<32x256xf32> to vector<4x256xf32>
    %74 = vector.extract_strided_slice %5 {offsets = [4, 0], sizes = [4, 256], strides = [1, 1]} : vector<32x256xf32> to vector<4x256xf32>
    %75 = vector.shape_cast %24 : vector<1x256xi1> to vector<1x256xi1>
    %76 = vector.broadcast %75 : vector<1x256xi1> to vector<4x256xi1>
    %77 = arith.select %76, %73, %74 : vector<4x256xi1>, vector<4x256xf32>
    %c6 = arith.constant 6 : index
    %c0_21 = arith.constant 0 : index
    %c0_22 = arith.constant 0 : index
    %78 = vector.load %arg7[%c6, %c0_21, %c0_22] : memref<8x4x256xf32, #tpu.memory_space<vmem>>, vector<1x4x256xf32>
    %79 = vector.shape_cast %78 : vector<1x4x256xf32> to vector<4x256xf32>
    %80 = vector.shape_cast %77 : vector<4x256xf32> to vector<1x4x256xf32>
    tpu.vector_store %arg7[%c6, %c0_21, %c0_22], %80 {strides = array<i32>} : memref<8x4x256xf32, #tpu.memory_space<vmem>>, vector<1x4x256xf32>,
    %81 = vector.extract_strided_slice %5 {offsets = [28, 0], sizes = [4, 256], strides = [1, 1]} : vector<32x256xf32> to vector<4x256xf32>
    %82 = vector.extract_strided_slice %5 {offsets = [0, 0], sizes = [4, 256], strides = [1, 1]} : vector<32x256xf32> to vector<4x256xf32>
    %83 = vector.shape_cast %24 : vector<1x256xi1> to vector<1x256xi1>
    %84 = vector.broadcast %83 : vector<1x256xi1> to vector<4x256xi1>
    %85 = arith.select %84, %81, %82 : vector<4x256xi1>, vector<4x256xf32>
    %c7 = arith.constant 7 : index
    %c0_23 = arith.constant 0 : index
    %c0_24 = arith.constant 0 : index
    %86 = vector.load %arg7[%c7, %c0_23, %c0_24] : memref<8x4x256xf32, #tpu.memory_space<vmem>>, vector<1x4x256xf32>
    %87 = vector.shape_cast %86 : vector<1x4x256xf32> to vector<4x256xf32>
    %88 = vector.shape_cast %85 : vector<4x256xf32> to vector<1x4x256xf32>
    tpu.vector_store %arg7[%c7, %c0_23, %c0_24], %88 {strides = array<i32>} : memref<8x4x256xf32, #tpu.memory_space<vmem>>, vector<1x4x256xf32>,
    %c0_25 = arith.constant 0 : index
    %c0_26 = arith.constant 0 : index
    %89 = vector.load %arg2[%c0_25, %c0_26] : memref<64x256xf32, #tpu.memory_space<vmem>>, vector<64x256xf32>
    %cst_27 = arith.constant 0.000000e+00 : f32
    %90 = vector.broadcast %cst_27 : f32 to vector<4x64xf32>
    %cst_28 = arith.constant 0.000000e+00 : f32
    %91 = vector.broadcast %cst_28 : f32 to vector<4x64xf32>
    %c0_29 = arith.constant 0 : index
    %c0_30 = arith.constant 0 : index
    %c0_31 = arith.constant 0 : index
    %92 = vector.load %arg7[%c0_29, %c0_30, %c0_31] : memref<8x4x256xf32, #tpu.memory_space<vmem>>, vector<1x4x256xf32>
    %93 = vector.shape_cast %92 : vector<1x4x256xf32> to vector<4x256xf32>
    %cst_32 = arith.constant dense<0.000000e+00> : vector<4x256xf32>
    %94 = tpu.matmul %90, %89, %cst_32 {dimension_numbers = #tpu.dot_dimension_numbers<[1], [0], [0], [1], [0, 0, 1, 1], [], []>} : vector<4x64xf32>, vector<64x256xf32>, vector<4x256xf32> -> vector<4x256xf32>
    %95 = arith.addf %93, %94 : vector<4x256xf32>
    %96 = arith.negf %95 : vector<4x256xf32>
    %97 = math.exp %96 : vector<4x256xf32>
    %cst_33 = arith.constant 1.000000e+00 : f32
    %98 = vector.broadcast %cst_33 : f32 to vector<4x256xf32>
    %99 = arith.addf %98, %97 : vector<4x256xf32>
    %100 = arith.divf %98, %99 : vector<4x256xf32>
    %101 = math.tanh %95 : vector<4x256xf32>
    %102 = vector.extract_strided_slice %100 {offsets = [0, 0], sizes = [4, 64], strides = [1, 1]} : vector<4x256xf32> to vector<4x64xf32>
    %103 = vector.extract_strided_slice %100 {offsets = [0, 64], sizes = [4, 64], strides = [1, 1]} : vector<4x256xf32> to vector<4x64xf32>
    %104 = vector.extract_strided_slice %101 {offsets = [0, 128], sizes = [4, 64], strides = [1, 1]} : vector<4x256xf32> to vector<4x64xf32>
    %105 = vector.extract_strided_slice %100 {offsets = [0, 192], sizes = [4, 64], strides = [1, 1]} : vector<4x256xf32> to vector<4x64xf32>
    %106 = arith.mulf %103, %91 : vector<4x64xf32>
    %107 = arith.mulf %102, %104 : vector<4x64xf32>
    %108 = arith.addf %106, %107 : vector<4x64xf32>
    %109 = math.tanh %108 : vector<4x64xf32>
    %110 = arith.mulf %105, %109 : vector<4x64xf32>
    %c1_34 = arith.constant 1 : index
    %c0_35 = arith.constant 0 : index
    %c0_36 = arith.constant 0 : index
    %111 = vector.load %arg7[%c1_34, %c0_35, %c0_36] : memref<8x4x256xf32, #tpu.memory_space<vmem>>, vector<1x4x256xf32>
    %112 = vector.shape_cast %111 : vector<1x4x256xf32> to vector<4x256xf32>
    %cst_37 = arith.constant dense<0.000000e+00> : vector<4x256xf32>
    %113 = tpu.matmul %110, %89, %cst_37 {dimension_numbers = #tpu.dot_dimension_numbers<[1], [0], [0], [1], [0, 0, 1, 1], [], []>} : vector<4x64xf32>, vector<64x256xf32>, vector<4x256xf32> -> vector<4x256xf32>
    %114 = arith.addf %112, %113 : vector<4x256xf32>
    %115 = arith.negf %114 : vector<4x256xf32>
    %116 = math.exp %115 : vector<4x256xf32>
    %cst_38 = arith.constant 1.000000e+00 : f32
    %117 = vector.broadcast %cst_38 : f32 to vector<4x256xf32>
    %118 = arith.addf %117, %116 : vector<4x256xf32>
    %119 = arith.divf %117, %118 : vector<4x256xf32>
    %120 = math.tanh %114 : vector<4x256xf32>
    %121 = vector.extract_strided_slice %119 {offsets = [0, 0], sizes = [4, 64], strides = [1, 1]} : vector<4x256xf32> to vector<4x64xf32>
    %122 = vector.extract_strided_slice %119 {offsets = [0, 64], sizes = [4, 64], strides = [1, 1]} : vector<4x256xf32> to vector<4x64xf32>
    %123 = vector.extract_strided_slice %120 {offsets = [0, 128], sizes = [4, 64], strides = [1, 1]} : vector<4x256xf32> to vector<4x64xf32>
    %124 = vector.extract_strided_slice %119 {offsets = [0, 192], sizes = [4, 64], strides = [1, 1]} : vector<4x256xf32> to vector<4x64xf32>
    %125 = arith.mulf %122, %108 : vector<4x64xf32>
    %126 = arith.mulf %121, %123 : vector<4x64xf32>
    %127 = arith.addf %125, %126 : vector<4x64xf32>
    %128 = math.tanh %127 : vector<4x64xf32>
    %129 = arith.mulf %124, %128 : vector<4x64xf32>
    %c2_39 = arith.constant 2 : index
    %c0_40 = arith.constant 0 : index
    %c0_41 = arith.constant 0 : index
    %130 = vector.load %arg7[%c2_39, %c0_40, %c0_41] : memref<8x4x256xf32, #tpu.memory_space<vmem>>, vector<1x4x256xf32>
    %131 = vector.shape_cast %130 : vector<1x4x256xf32> to vector<4x256xf32>
    %cst_42 = arith.constant dense<0.000000e+00> : vector<4x256xf32>
    %132 = tpu.matmul %129, %89, %cst_42 {dimension_numbers = #tpu.dot_dimension_numbers<[1], [0], [0], [1], [0, 0, 1, 1], [], []>} : vector<4x64xf32>, vector<64x256xf32>, vector<4x256xf32> -> vector<4x256xf32>
    %133 = arith.addf %131, %132 : vector<4x256xf32>
    %134 = arith.negf %133 : vector<4x256xf32>
    %135 = math.exp %134 : vector<4x256xf32>
    %cst_43 = arith.constant 1.000000e+00 : f32
    %136 = vector.broadcast %cst_43 : f32 to vector<4x256xf32>
    %137 = arith.addf %136, %135 : vector<4x256xf32>
    %138 = arith.divf %136, %137 : vector<4x256xf32>
    %139 = math.tanh %133 : vector<4x256xf32>
    %140 = vector.extract_strided_slice %138 {offsets = [0, 0], sizes = [4, 64], strides = [1, 1]} : vector<4x256xf32> to vector<4x64xf32>
    %141 = vector.extract_strided_slice %138 {offsets = [0, 64], sizes = [4, 64], strides = [1, 1]} : vector<4x256xf32> to vector<4x64xf32>
    %142 = vector.extract_strided_slice %139 {offsets = [0, 128], sizes = [4, 64], strides = [1, 1]} : vector<4x256xf32> to vector<4x64xf32>
    %143 = vector.extract_strided_slice %138 {offsets = [0, 192], sizes = [4, 64], strides = [1, 1]} : vector<4x256xf32> to vector<4x64xf32>
    %144 = arith.mulf %141, %127 : vector<4x64xf32>
    %145 = arith.mulf %140, %142 : vector<4x64xf32>
    %146 = arith.addf %144, %145 : vector<4x64xf32>
    %147 = math.tanh %146 : vector<4x64xf32>
    %148 = arith.mulf %143, %147 : vector<4x64xf32>
    %c3_44 = arith.constant 3 : index
    %c0_45 = arith.constant 0 : index
    %c0_46 = arith.constant 0 : index
    %149 = vector.load %arg7[%c3_44, %c0_45, %c0_46] : memref<8x4x256xf32, #tpu.memory_space<vmem>>, vector<1x4x256xf32>
    %150 = vector.shape_cast %149 : vector<1x4x256xf32> to vector<4x256xf32>
    %cst_47 = arith.constant dense<0.000000e+00> : vector<4x256xf32>
    %151 = tpu.matmul %148, %89, %cst_47 {dimension_numbers = #tpu.dot_dimension_numbers<[1], [0], [0], [1], [0, 0, 1, 1], [], []>} : vector<4x64xf32>, vector<64x256xf32>, vector<4x256xf32> -> vector<4x256xf32>
    %152 = arith.addf %150, %151 : vector<4x256xf32>
    %153 = arith.negf %152 : vector<4x256xf32>
    %154 = math.exp %153 : vector<4x256xf32>
    %cst_48 = arith.constant 1.000000e+00 : f32
    %155 = vector.broadcast %cst_48 : f32 to vector<4x256xf32>
    %156 = arith.addf %155, %154 : vector<4x256xf32>
    %157 = arith.divf %155, %156 : vector<4x256xf32>
    %158 = math.tanh %152 : vector<4x256xf32>
    %159 = vector.extract_strided_slice %157 {offsets = [0, 0], sizes = [4, 64], strides = [1, 1]} : vector<4x256xf32> to vector<4x64xf32>
    %160 = vector.extract_strided_slice %157 {offsets = [0, 64], sizes = [4, 64], strides = [1, 1]} : vector<4x256xf32> to vector<4x64xf32>
    %161 = vector.extract_strided_slice %158 {offsets = [0, 128], sizes = [4, 64], strides = [1, 1]} : vector<4x256xf32> to vector<4x64xf32>
    %162 = vector.extract_strided_slice %157 {offsets = [0, 192], sizes = [4, 64], strides = [1, 1]} : vector<4x256xf32> to vector<4x64xf32>
    %163 = arith.mulf %160, %146 : vector<4x64xf32>
    %164 = arith.mulf %159, %161 : vector<4x64xf32>
    %165 = arith.addf %163, %164 : vector<4x64xf32>
    %166 = math.tanh %165 : vector<4x64xf32>
    %167 = arith.mulf %162, %166 : vector<4x64xf32>
    %c4_49 = arith.constant 4 : index
    %c0_50 = arith.constant 0 : index
    %c0_51 = arith.constant 0 : index
    %168 = vector.load %arg7[%c4_49, %c0_50, %c0_51] : memref<8x4x256xf32, #tpu.memory_space<vmem>>, vector<1x4x256xf32>
    %169 = vector.shape_cast %168 : vector<1x4x256xf32> to vector<4x256xf32>
    %cst_52 = arith.constant dense<0.000000e+00> : vector<4x256xf32>
    %170 = tpu.matmul %167, %89, %cst_52 {dimension_numbers = #tpu.dot_dimension_numbers<[1], [0], [0], [1], [0, 0, 1, 1], [], []>} : vector<4x64xf32>, vector<64x256xf32>, vector<4x256xf32> -> vector<4x256xf32>
    %171 = arith.addf %169, %170 : vector<4x256xf32>
    %172 = arith.negf %171 : vector<4x256xf32>
    %173 = math.exp %172 : vector<4x256xf32>
    %cst_53 = arith.constant 1.000000e+00 : f32
    %174 = vector.broadcast %cst_53 : f32 to vector<4x256xf32>
    %175 = arith.addf %174, %173 : vector<4x256xf32>
    %176 = arith.divf %174, %175 : vector<4x256xf32>
    %177 = math.tanh %171 : vector<4x256xf32>
    %178 = vector.extract_strided_slice %176 {offsets = [0, 0], sizes = [4, 64], strides = [1, 1]} : vector<4x256xf32> to vector<4x64xf32>
    %179 = vector.extract_strided_slice %176 {offsets = [0, 64], sizes = [4, 64], strides = [1, 1]} : vector<4x256xf32> to vector<4x64xf32>
    %180 = vector.extract_strided_slice %177 {offsets = [0, 128], sizes = [4, 64], strides = [1, 1]} : vector<4x256xf32> to vector<4x64xf32>
    %181 = vector.extract_strided_slice %176 {offsets = [0, 192], sizes = [4, 64], strides = [1, 1]} : vector<4x256xf32> to vector<4x64xf32>
    %182 = arith.mulf %179, %165 : vector<4x64xf32>
    %183 = arith.mulf %178, %180 : vector<4x64xf32>
    %184 = arith.addf %182, %183 : vector<4x64xf32>
    %185 = math.tanh %184 : vector<4x64xf32>
    %186 = arith.mulf %181, %185 : vector<4x64xf32>
    %c5_54 = arith.constant 5 : index
    %c0_55 = arith.constant 0 : index
    %c0_56 = arith.constant 0 : index
    %187 = vector.load %arg7[%c5_54, %c0_55, %c0_56] : memref<8x4x256xf32, #tpu.memory_space<vmem>>, vector<1x4x256xf32>
    %188 = vector.shape_cast %187 : vector<1x4x256xf32> to vector<4x256xf32>
    %cst_57 = arith.constant dense<0.000000e+00> : vector<4x256xf32>
    %189 = tpu.matmul %186, %89, %cst_57 {dimension_numbers = #tpu.dot_dimension_numbers<[1], [0], [0], [1], [0, 0, 1, 1], [], []>} : vector<4x64xf32>, vector<64x256xf32>, vector<4x256xf32> -> vector<4x256xf32>
    %190 = arith.addf %188, %189 : vector<4x256xf32>
    %191 = arith.negf %190 : vector<4x256xf32>
    %192 = math.exp %191 : vector<4x256xf32>
    %cst_58 = arith.constant 1.000000e+00 : f32
    %193 = vector.broadcast %cst_58 : f32 to vector<4x256xf32>
    %194 = arith.addf %193, %192 : vector<4x256xf32>
    %195 = arith.divf %193, %194 : vector<4x256xf32>
    %196 = math.tanh %190 : vector<4x256xf32>
    %197 = vector.extract_strided_slice %195 {offsets = [0, 0], sizes = [4, 64], strides = [1, 1]} : vector<4x256xf32> to vector<4x64xf32>
    %198 = vector.extract_strided_slice %195 {offsets = [0, 64], sizes = [4, 64], strides = [1, 1]} : vector<4x256xf32> to vector<4x64xf32>
    %199 = vector.extract_strided_slice %196 {offsets = [0, 128], sizes = [4, 64], strides = [1, 1]} : vector<4x256xf32> to vector<4x64xf32>
    %200 = vector.extract_strided_slice %195 {offsets = [0, 192], sizes = [4, 64], strides = [1, 1]} : vector<4x256xf32> to vector<4x64xf32>
    %201 = arith.mulf %198, %184 : vector<4x64xf32>
    %202 = arith.mulf %197, %199 : vector<4x64xf32>
    %203 = arith.addf %201, %202 : vector<4x64xf32>
    %204 = math.tanh %203 : vector<4x64xf32>
    %205 = arith.mulf %200, %204 : vector<4x64xf32>
    %c6_59 = arith.constant 6 : index
    %c0_60 = arith.constant 0 : index
    %c0_61 = arith.constant 0 : index
    %206 = vector.load %arg7[%c6_59, %c0_60, %c0_61] : memref<8x4x256xf32, #tpu.memory_space<vmem>>, vector<1x4x256xf32>
    %207 = vector.shape_cast %206 : vector<1x4x256xf32> to vector<4x256xf32>
    %cst_62 = arith.constant dense<0.000000e+00> : vector<4x256xf32>
    %208 = tpu.matmul %205, %89, %cst_62 {dimension_numbers = #tpu.dot_dimension_numbers<[1], [0], [0], [1], [0, 0, 1, 1], [], []>} : vector<4x64xf32>, vector<64x256xf32>, vector<4x256xf32> -> vector<4x256xf32>
    %209 = arith.addf %207, %208 : vector<4x256xf32>
    %210 = arith.negf %209 : vector<4x256xf32>
    %211 = math.exp %210 : vector<4x256xf32>
    %cst_63 = arith.constant 1.000000e+00 : f32
    %212 = vector.broadcast %cst_63 : f32 to vector<4x256xf32>
    %213 = arith.addf %212, %211 : vector<4x256xf32>
    %214 = arith.divf %212, %213 : vector<4x256xf32>
    %215 = math.tanh %209 : vector<4x256xf32>
    %216 = vector.extract_strided_slice %214 {offsets = [0, 0], sizes = [4, 64], strides = [1, 1]} : vector<4x256xf32> to vector<4x64xf32>
    %217 = vector.extract_strided_slice %214 {offsets = [0, 64], sizes = [4, 64], strides = [1, 1]} : vector<4x256xf32> to vector<4x64xf32>
    %218 = vector.extract_strided_slice %215 {offsets = [0, 128], sizes = [4, 64], strides = [1, 1]} : vector<4x256xf32> to vector<4x64xf32>
    %219 = vector.extract_strided_slice %214 {offsets = [0, 192], sizes = [4, 64], strides = [1, 1]} : vector<4x256xf32> to vector<4x64xf32>
    %220 = arith.mulf %217, %203 : vector<4x64xf32>
    %221 = arith.mulf %216, %218 : vector<4x64xf32>
    %222 = arith.addf %220, %221 : vector<4x64xf32>
    %223 = math.tanh %222 : vector<4x64xf32>
    %224 = arith.mulf %219, %223 : vector<4x64xf32>
    %c7_64 = arith.constant 7 : index
    %c0_65 = arith.constant 0 : index
    %c0_66 = arith.constant 0 : index
    %225 = vector.load %arg7[%c7_64, %c0_65, %c0_66] : memref<8x4x256xf32, #tpu.memory_space<vmem>>, vector<1x4x256xf32>
    %226 = vector.shape_cast %225 : vector<1x4x256xf32> to vector<4x256xf32>
    %cst_67 = arith.constant dense<0.000000e+00> : vector<4x256xf32>
    %227 = tpu.matmul %224, %89, %cst_67 {dimension_numbers = #tpu.dot_dimension_numbers<[1], [0], [0], [1], [0, 0, 1, 1], [], []>} : vector<4x64xf32>, vector<64x256xf32>, vector<4x256xf32> -> vector<4x256xf32>
    %228 = arith.addf %226, %227 : vector<4x256xf32>
    %229 = arith.negf %228 : vector<4x256xf32>
    %230 = math.exp %229 : vector<4x256xf32>
    %cst_68 = arith.constant 1.000000e+00 : f32
    %231 = vector.broadcast %cst_68 : f32 to vector<4x256xf32>
    %232 = arith.addf %231, %230 : vector<4x256xf32>
    %233 = arith.divf %231, %232 : vector<4x256xf32>
    %234 = math.tanh %228 : vector<4x256xf32>
    %235 = vector.extract_strided_slice %233 {offsets = [0, 0], sizes = [4, 64], strides = [1, 1]} : vector<4x256xf32> to vector<4x64xf32>
    %236 = vector.extract_strided_slice %233 {offsets = [0, 64], sizes = [4, 64], strides = [1, 1]} : vector<4x256xf32> to vector<4x64xf32>
    %237 = vector.extract_strided_slice %234 {offsets = [0, 128], sizes = [4, 64], strides = [1, 1]} : vector<4x256xf32> to vector<4x64xf32>
    %238 = vector.extract_strided_slice %233 {offsets = [0, 192], sizes = [4, 64], strides = [1, 1]} : vector<4x256xf32> to vector<4x64xf32>
    %239 = arith.mulf %236, %222 : vector<4x64xf32>
    %240 = arith.mulf %235, %237 : vector<4x64xf32>
    %241 = arith.addf %239, %240 : vector<4x64xf32>
    %242 = math.tanh %241 : vector<4x64xf32>
    %243 = arith.mulf %238, %242 : vector<4x64xf32>
    %c0_69 = arith.constant 0 : index
    %c0_70 = arith.constant 0 : index
    %244 = vector.load %arg4[%c0_69, %c0_70] : memref<64x128xf32, #tpu.memory_space<vmem>>, vector<64x128xf32>
    %cst_71 = arith.constant dense<0.000000e+00> : vector<4x128xf32>
    %245 = tpu.matmul %243, %244, %cst_71 {dimension_numbers = #tpu.dot_dimension_numbers<[1], [0], [0], [1], [0, 0, 1, 1], [], []>} : vector<4x64xf32>, vector<64x128xf32>, vector<4x128xf32> -> vector<4x128xf32>
    %c0_72 = arith.constant 0 : index
    %c0_73 = arith.constant 0 : index
    %246 = vector.load %arg5[%c0_72, %c0_73] : memref<1x128xf32, #tpu.memory_space<vmem>>, vector<1x128xf32>
    %247 = vector.broadcast %246 : vector<1x128xf32> to vector<4x128xf32>
    %248 = arith.addf %245, %247 : vector<4x128xf32>
    %c0_74 = arith.constant 0 : index
    %c0_75 = arith.constant 0 : index
    %249 = vector.load %arg6[%c0_74, %c0_75] : memref<4x128xf32, #tpu.memory_space<vmem>>, vector<4x128xf32>
    tpu.vector_store %arg6[%c0_74, %c0_75], %248 {strides = array<i32>} : memref<4x128xf32, #tpu.memory_space<vmem>>, vector<4x128xf32>,
    return
  }
}

</mosaic_0001>

<bundles_post_ra>
// kernel: rnn_model_forward.1
= control target key start
LH: loop header
LB: loop body
LE: loop exit
PB: predicated region body
PF: predicated region fallthrough
CT: control target
= control target key end

     0   :  { %vm42_vm0 = vcmask 261120   ;;  %s1580_s0 = inlined_call_operand.vmem [shape: f32[32,32], index: 0, kind: input, shape index: {}]   ;;  %s1581_s1 = inlined_call_operand.vmem [shape: f32[32,256], index: 1, kind: input, shape index: {}]   ;;  %s1582_s2 = inlined_call_operand.vmem [shape: f32[64,256], index: 2, kind: input, shape index: {}]   ;;  %s1583_s3 = inlined_call_operand.vmem [shape: f32[1,256], index: 3, kind: input, shape index: {}]   ;;  %s1584_s4 = inlined_call_operand.vmem [shape: f32[64,128], index: 4, kind: input, shape index: {}]   ;;  %s1585_s5 = inlined_call_operand.vmem [shape: f32[1,128], index: 5, kind: input, shape index: {}]   ;;  %s1586_s6 = inlined_call_operand.hbm [shape: f32[4,128], index: 6, kind: output, shape index: {}]  }
   0x1   :  { %v34_v0 = vld [vmem:[%s1581_s1 + $0x30] sm:$0xff]  ;;  %v32_v1 = vld [vmem:[%s1581_s1 + $0x20] sm:$0xff]  ;;  %v1210_v3 = vld [vmem:[%s1582_s2 + $0x78] sm:$0xff] }
   0x2   :  { %67 = vmatpush.msra.mxu0 %v34_v0  ;;  %1062 = vmatpush.msra.mxu1 %v34_v0  ;;  %v30_v2 = vld [vmem:[%s1581_s1 + $0x10] sm:$0xff]  ;;  %v28_v4 = vld [vmem:[%s1581_s1] sm:$0xff]  ;;  %v1224_v6 = vld [vmem:[%s1582_s2 + $0x68] sm:$0xff] }
   0x3   :  { %283 = vmatpush.msra.mxu3 %v1210_v3  ;;  %v1219_v5 = vld [vmem:[%s1582_s2 + $0x70] sm:$0xff]  ;;  %v24_v7 = vld [vmem:[%s1580_s0] sm:$0xff]  ;;  %v1232_v8 = vld [vmem:[%s1580_s0 + $0x18] sm:$0xff] }
   0x4   :  { %68 = vmatpush.msra.mxu0 %v32_v1  ;;  %1063 = vmatpush.msra.mxu1 %v32_v1  ;;  %v35_v9 = vld [vmem:[%s1581_s1 + $0x38] sm:$0xff]  ;;  %v1242_v10 = vld [vmem:[%s1582_s2 + $0x60] sm:$0xff]  ;;  %v33_v12 = vld [vmem:[%s1581_s1 + $0x28] sm:$0xff] }
   0x5   :  { %263 = vmatpush.msra.mxu2 %v1219_v5  ;;  %284 = vmatpush.msra.mxu3 %v1224_v6  ;;  %v1247_v11 = vld [vmem:[%s1582_s2 + $0x58] sm:$0xff]  ;;  %v1258_v13 = vld [vmem:[%s1582_s2 + $0x50] sm:$0xff]  ;;  %v1264_v14 = vld [vmem:[%s1582_s2 + $0x48] sm:$0xff] }
   0x6   :  { %69 = vmatpush.msra.mxu0 %v30_v2  ;;  %1064 = vmatpush.msra.mxu1 %v30_v2  ;;  %v31_v15 = vld [vmem:[%s1581_s1 + $0x18] sm:$0xff]  ;;  %v1273_v16 = vld [vmem:[%s1582_s2 + $0x40] sm:$0xff] }
   0x7   :  { %264 = vmatpush.msra.mxu2 %v1242_v10  ;;  %285 = vmatpush.msra.mxu3 %v1247_v11 }
   0x8   :  { %70 = vmatpush.msra.mxu0 %v28_v4  ;;  %1065 = vmatpush.msra.mxu1 %v28_v4 }
   0x9   :  { %1031 = vmatmul.msk.f32.vlgmr.msra.gmra.mxu0 %vm42_vm0, %v24_v7  ;;  %1034 = vmatmul.msk.f32.vlgmr.msra.gmra.mxu1 %vm42_vm0, %v1232_v8 }
   0xa   :  { %96 = vmatpush.msrb.mxu1 %v35_v9  ;;  %445 = vmatpush.msrb.mxu0 %v1219_v5 }
   0xb   :  { %11 = vsyncpa [#allocation4], 0  ;;  %265 = vmatpush.msra.mxu2 %v1258_v13  ;;  %v1280_v17 = vld [vmem:[%s1582_s2 + $0x38] sm:$0xff]  ;;  %v29_v18 = vld [vmem:[%s1581_s1 + $0x8] sm:$0xff]  ;;  %286 = vmatpush.msra.mxu3 %v1264_v14  ;;  %v1160_v27 = vmov 0.0   ;;  %v113_v29 = vlaneseq  ;;  %vm157_vm3 = vcmask 1043456  }
   0xc   :  { %97 = vmatpush.msrb.mxu1 %v33_v12  ;;  %v1289_v19 = vld [vmem:[%s1582_s2 + $0x30] sm:$0xff]  ;;  %446 = vmatpush.msrb.mxu0 %v1242_v10  ;;  %v1297_v20 = vld [vmem:[%s1582_s2 + $0x28] sm:$0xff]  ;;  %v1302_v21 = vld [vmem:[%s1582_s2 + $0x20] sm:$0xff]  ;;  %vm251_vm8 = vcmask 523264   ;;  %s1162_s21 = smov [#allocation3]   ;;  %s1022_s25 = sshll.u32 %s1586_s6, 4  ;;  %s1023_s25 = int_to_ptr.hbm [resolvable:$true] %s1022_s25 }
   0xd   :  { %266 = vmatpush.msra.mxu2 %v1273_v16  ;;  %287 = vmatpush.msra.mxu3 %v1280_v17  ;;  %v25_v22 = vld [vmem:[%s1580_s0 + $0x8] sm:$0xff]  ;;  %v1314_v23 = vld [vmem:[%s1582_s2 + $0x18] sm:$0xff]  ;;  %v1319_v24 = vld [vmem:[%s1582_s2 + $0x10] sm:$0xff]  ;;  %v114_v31 = vand.u32 127, %v113_v29  ;;  %s1020_s22 = sshll.u32 %s1162_s21, 4  ;;  %s1021_s22 = int_to_ptr.vmem [resolvable:$true] %s1020_s22 }
   0xe   :  { %98 = vmatpush.msrb.mxu1 %v31_v15  ;;  %447 = vmatpush.msrb.mxu0 %v1258_v13  ;;  %v1326_v25 = vld [vmem:[%s1582_s2 + $0x8] sm:$0xff]  ;;  %v1331_v26 = vld [vmem:[%s1582_s2] sm:$0xff]  ;;  %v26_v28 = vld [vmem:[%s1580_s0 + $0x10] sm:$0xff] }
   0xf   :  { %267 = vmatpush.msra.mxu2 %v1289_v19  ;;  %288 = vmatpush.msra.mxu3 %v1297_v20  ;;  %v36_v30 = vld [vmem:[%s1583_s3] sm:$0x3]  ;;  %v120_v33 = vand.u32 63, %v114_v31  ;;  %v115_v44 = vadd.s32 128, %v114_v31  ;;  %s1161_s3 = smov 64  }
  0x10   :  { %99 = vmatpush.msrb.mxu1 %v29_v18  ;;  %448 = vmatpush.msrb.mxu0 %v1273_v16  ;;  %v38_v32 = vperm.slane %v36_v30, 0  ;;  %v39_v46 = vperm.slane %v36_v30, 1 }
  0x11   :  { %1035 = vmatmul.msk.f32.vlgmr.msrb.gmra.mxu1 %vm42_vm0, %v24_v7  ;;  %1032 = vmatmul.msk.f32.gmra.mxu0 %vm42_vm0, %v25_v22  ;;  %vm1409_vm1 = vcmp.lt.s32.totalorder %v120_v33, 32  ;;  %v127_v48 = vand.u32 63, %v115_v44 }
  0x12   :  { %268 = vmatpush.msra.mxu2 %v1302_v21  ;;  %465 = vmatpush.msra.mxu1 %v1210_v3 }
  0x13   :  { %289 = vmatpush.msra.mxu3 %v1314_v23  ;;  %449 = vmatpush.msrb.mxu0 %v1289_v19  ;;  %vm1415_vm2 = vcmp.lt.s32.totalorder %v127_v48, 32 }
  0x14   :  { %269 = vmatpush.msra.mxu2 %v1319_v24  ;;  %466 = vmatpush.msra.mxu1 %v1224_v6 }
  0x15   :  { %290 = vmatpush.msra.mxu3 %v1326_v25  ;;  %450 = vmatpush.msrb.mxu0 %v1302_v21 }
  0x16   :  { %270 = vmatpush.msra.mxu2 %v1331_v26  ;;  %291 = vmatmul.f32.vlgmr.msra.gmra.mxu3 %v1160_v27 }
  0x17   :  { %271 = vmatmul.f32.vlgmr.msra.gmra.mxu2 %v1160_v27  ;;  %374 = vmatpush.msrb.mxu3 %v1210_v3 }
  0x18   :  { %354 = vmatpush.msrb.mxu2 %v1219_v5  ;;  %467 = vmatpush.msra.mxu1 %v1247_v11 }
  0x19   :  { %1036 = vmatmul.msk.f32.gmra.mxu1 %vm42_vm0, %v25_v22  ;;  %1033 = vmatmul.msk.f32.gmra.mxu0 %vm42_vm0, %v26_v28 }
  0x1a   :  { %355 = vmatpush.msrb.mxu2 %v1242_v10  ;;  %375 = vmatpush.msrb.mxu3 %v1224_v6 }
  0x1b   :  { %468 = vmatpush.msra.mxu1 %v1264_v14  ;;  %451 = vmatpush.msrb.mxu0 %v1319_v24 }
  0x1c   :  { %356 = vmatpush.msrb.mxu2 %v1258_v13  ;;  %376 = vmatpush.msrb.mxu3 %v1247_v11 }
  0x1d   :  { %469 = vmatpush.msra.mxu1 %v1280_v17  ;;  %452 = vmatpush.msrb.mxu0 %v1331_v26 }
  0x1e   :  { %357 = vmatpush.msrb.mxu2 %v1273_v16  ;;  %377 = vmatpush.msrb.mxu3 %v1264_v14 }
  0x1f   :  { %627 = vmatpush.msra.mxu0 %v1219_v5  ;;  %470 = vmatpush.msra.mxu1 %v1297_v20 }
  0x20   :  { %358 = vmatpush.msrb.mxu2 %v1289_v19  ;;  %378 = vmatpush.msrb.mxu3 %v1280_v17 }
  0x21   :  { %1037 = vmatmul.msk.f32.gmra.mxu1 %vm42_vm0, %v26_v28  ;;  %628 = vmatpush.msra.mxu0 %v1242_v10 }
  0x22   :  { %359 = vmatpush.msrb.mxu2 %v1302_v21  ;;  %379 = vmatpush.msrb.mxu3 %v1297_v20 }
  0x23   :  { %471 = vmatpush.msra.mxu1 %v1314_v23  ;;  %629 = vmatpush.msra.mxu0 %v1258_v13 }
  0x24   :  { %360 = vmatpush.msrb.mxu2 %v1319_v24  ;;  %380 = vmatpush.msrb.mxu3 %v1314_v23 }
  0x25   :  { %472 = vmatpush.msra.mxu1 %v1326_v25  ;;  %630 = vmatpush.msra.mxu0 %v1273_v16 }
  0x26   :  { %361 = vmatpush.msrb.mxu2 %v1331_v26  ;;  %381 = vmatpush.msrb.mxu3 %v1326_v25 }
  0x27   :  { %647 = vmatpush.msrb.mxu1 %v1210_v3  ;;  %631 = vmatpush.msra.mxu0 %v1289_v19 }
  0x28   :  { %536 = vmatpush.msra.mxu2 %v1219_v5  ;;  %556 = vmatpush.msra.mxu3 %v1210_v3 }
  0x29   :  { %1038 = vmatmul.msk.f32.gmra.mxu1 %vm42_vm0, %v1232_v8  ;;  %632 = vmatpush.msra.mxu0 %v1302_v21 }
  0x2a   :  { %537 = vmatpush.msra.mxu2 %v1242_v10  ;;  %557 = vmatpush.msra.mxu3 %v1224_v6 }
  0x2b   :  { %648 = vmatpush.msrb.mxu1 %v1224_v6  ;;  %633 = vmatpush.msra.mxu0 %v1319_v24 }
  0x2c   :  { %538 = vmatpush.msra.mxu2 %v1258_v13  ;;  %558 = vmatpush.msra.mxu3 %v1247_v11 }
  0x2d   :  { %649 = vmatpush.msrb.mxu1 %v1247_v11  ;;  %634 = vmatpush.msra.mxu0 %v1331_v26 }
  0x2e   :  { %539 = vmatpush.msra.mxu2 %v1273_v16  ;;  %559 = vmatpush.msra.mxu3 %v1264_v14 }
  0x2f   :  { %650 = vmatpush.msrb.mxu1 %v1264_v14 }
  0x30   :  { %540 = vmatpush.msra.mxu2 %v1289_v19  ;;  %560 = vmatpush.msra.mxu3 %v1280_v17 }
  0x31   :  { %651 = vmatpush.msrb.mxu1 %v1280_v17 }
  0x32   :  { %541 = vmatpush.msra.mxu2 %v1302_v21  ;;  %561 = vmatpush.msra.mxu3 %v1297_v20 }
  0x33   :  { %652 = vmatpush.msrb.mxu1 %v1297_v20 }
  0x34   :  { %542 = vmatpush.msra.mxu2 %v1319_v24  ;;  %562 = vmatpush.msra.mxu3 %v1314_v23 }
  0x35   :  { %653 = vmatpush.msrb.mxu1 %v1314_v23 }
  0x36   :  { %543 = vmatpush.msra.mxu2 %v1331_v26  ;;  %563 = vmatpush.msra.mxu3 %v1326_v25 }
  0x37   :  { %654 = vmatpush.msrb.mxu1 %v1326_v25 }
  0x86   :  { %v72_v34 = vpop.f32.mrf.mxu0  ;;  %v81_v35 = vpop.f32.mrf.mxu1 }
  0x87   :  { %v82_v36 = vadd.f32 %v81_v35, %v38_v32  ;;  %v73_v38 = vadd.f32 %v72_v34, %v38_v32 }
  0x89   :  { %v148_v39 = vrot.slane %v82_v36, 4  ;;  %v214_v8 = vrot.slane %v73_v38, 4 }
  0x8b   :  { %v152_v40 = vsel %vm1409_vm1, %v73_v38, %v148_v39  ;;  %v218_v29 = vsel %vm1409_vm1, %v82_v36, %v214_v8 }
  0x8c   :  { %161 = vst.sshfl [vmem:[#allocation1] sm:$0xff pattern:$0x75316420] %v152_v40 }
  0x8e   :  { %v101_v41 = vpop.f32.mrf.mxu1  ;;  %v75_v42 = vpop.f32.mrf.mxu0 }
  0x8f   :  { %v76_v47 = vadd.f32 %v75_v42, %v38_v32  ;;  %v102_v61 = vadd.f32 %v101_v41, %v39_v46 }
  0x91   :  { %v192_v51 = vrot.slane %v76_v47, 4  ;;  %v215_v9 = vrot.slane %v102_v61, 4 }
  0x96   :  { %v104_v43 = vpop.f32.mrf.mxu1  ;;  %v78_v45 = vpop.f32.mrf.mxu0 }
  0x97   :  { %v105_v49 = vadd.f32 %v104_v43, %v39_v46  ;;  %v79_v50 = vadd.f32 %v78_v45, %v38_v32 }
  0x99   :  { %v193_v54 = vrot.slane %v105_v49, 4  ;;  %v170_v56 = vrot.slane %v79_v50, 4  ;;  %v196_v59 = vsel %vm1409_vm1, %v79_v50, %v192_v51  ;;  %v292_v2 = vpop.f32.mrf.mxu3 }
  0x9a   :  { %v297_v15 = vrot.slane %v292_v2, 4  ;;  %v272_v27 = vpop.f32.mrf.mxu2 }
  0x9b   :  { %v174_v63 = vsel %vm1409_vm1, %v76_v47, %v170_v56 }
  0x9c   :  { %v298_v32 = vsel %vm157_vm3, %v272_v27, %v297_v15 }
  0x9e   :  { %v107_v52 = vpop.f32.mrf.mxu1 }
  0x9f   :  { %v108_v55 = vadd.f32 %v107_v52, %v39_v46 }
  0xa1   :  { %v171_v57 = vrot.slane %v108_v55, 4  ;;  %v197_v58 = vsel %vm1415_vm2, %v108_v55, %v193_v54 }
  0xa2   :  { %v200_v60 = vrot.slane %v197_v58, 4 }
  0xa3   :  { %v175_v62 = vsel %vm1415_vm2, %v105_v49, %v171_v57 }
  0xa4   :  { %v178_v0 = vrot.slane %v175_v62, 4  ;;  %v1428_v1 = vsel %vm157_vm3, %v196_v59, %v200_v60 }
  0xa6   :  { %v110_v4 = vpop.f32.mrf.mxu1  ;;  %v1431_v7 = vsel %vm157_vm3, %v174_v63, %v178_v0 }
  0xa7   :  { %v111_v12 = vadd.f32 %v110_v4, %v39_v46 }
  0xa9   :  { %v149_v18 = vrot.slane %v111_v12, 4  ;;  %v219_v22 = vsel %vm1415_vm2, %v111_v12, %v215_v9 }
  0xaa   :  { %v222_v28 = vrot.slane %v219_v22, 4 }
  0xab   :  { %v153_v30 = vsel %vm1415_vm2, %v102_v61, %v149_v18 }
  0xac   :  { %v156_v31 = vrot.slane %v153_v30, 4  ;;  %162 = vst.sshfl [vmem:[#allocation1 + $0x8] sm:$0xff pattern:$0x75316420] %v153_v30  ;;  %v1441_v33 = vsel %vm157_vm3, %v218_v29, %v222_v28 }
  0xae   :  { %v158_v34 = vsel %vm157_vm3, %v152_v40, %v156_v31 }
  0xaf   :  { %v300_v35 = vadd.f32 %v298_v32, %v158_v34 }
  0xb1   :  { %v1039_v38 = vmul.f32 -1.442695, %v300_v35 }
  0xb3   :  { %v1444_v39 = vld [vmem:[#allocation1 + $0x1] ss:$2 sm:$0xff]  ;;  %1070 = vpow2.f32 %v1039_v38 }
  0xb4   :  { %183 = vst.sshfl [vmem:[#allocation1] sm:$0xff pattern:$0x75316420] %v174_v63 }
  0xb5   :  { %184 = vst.sshfl [vmem:[#allocation1 + $0x8] sm:$0xff pattern:$0x75316420] %v175_v62 }
  0xb9   :  { %v1071_v36 = vpop.eup %1070 }
  0xba   :  { %v304_v37 = vadd.f32 1.0, %v1071_v36 }
  0xbc   :  { %1072 = vrcp.f32 %v304_v37  ;;  %v1446_v41 = vld [vmem:[#allocation1 + $0x1] ss:$2 sm:$0xff]  ;;  %v316_v40 = vand.u32 2147483648, %v304_v37  ;;  %v314_v47 = vand.u32 2147483647, %v304_v37  ;;  %vm310_vm5 = vweird.f32 %v304_v37 }
  0xbd   :  { %205 = vst.sshfl [vmem:[#allocation1] sm:$0xff pattern:$0x75316420] %v196_v59  ;;  %1074 = vtanh.f32 %v300_v35 }
  0xbe   :  { %206 = vst.sshfl [vmem:[#allocation1 + $0x8] sm:$0xff pattern:$0x75316420] %v197_v58  ;;  %v317_v50 = vor.u32 1.1754944e-38, %v316_v40  ;;  %vm315_vm7 = vcmp.eq.f32.partialorder %v314_v47, 8.507059e+37 }
  0xc2   :  { %v1073_v42 = vpop.eup %1072 }
  0xc3   :  { %v306_v43 = vmul.f32 %v1073_v42, %v304_v37  ;;  %vm311_vm4 = vweird.f32 %v1073_v42  ;;  %v1075_v48 = vpop.eup %1074 }
  0xc4   :  { %vm312_vm6 = vmor %vm310_vm5, %vm311_vm4  ;;  %v323_v52 = vrot.slane %v1075_v48, 4 }
  0xc5   :  { %v307_v44 = vsub.f32 1.0, %v306_v43  ;;  %v1448_v45 = vld [vmem:[#allocation1 + $0x1] ss:$2 sm:$0xff] }
  0xc6   :  { %227 = vst.sshfl [vmem:[#allocation1] sm:$0xff pattern:$0x75316420] %v218_v29 }
  0xc7   :  { %v308_v46 = vmul.f32 %v1073_v42, %v307_v44  ;;  %228 = vst.sshfl [vmem:[#allocation1 + $0x8] sm:$0xff pattern:$0x75316420] %v219_v22 }
  0xc9   :  { %v309_v49 = vadd.f32 %v1073_v42, %v308_v46 }
  0xcb   :  { %v313_v51 = vsel %vm312_vm6, %v1073_v42, %v309_v49 }
  0xcc   :  { %v318_v53 = vsel %vm315_vm7, %v317_v50, %v313_v51 }
  0xcd   :  { %v325_v54 = vmul.f32 %v323_v52, %v318_v53  ;;  %v321_v55 = vmul.f32 0.0, %v318_v53 }
  0xcf   :  { %327 = vrot.lane.b32.xlu0 %v325_v54, %s1161_s3 }
  0xd7   :  { %333 = vrot.lane.b32.xlu0 %v318_v53, %s1161_s3 }
 0x141   :  { %v328_v56 = vpop.permute.xlu0 %327 }
 0x142   :  { %v330_v57 = vadd.f32 %v328_v56, %v321_v55 }
 0x144   :  { %1076 = vtanh.f32 %v330_v57 }
 0x149   :  { %v334_v59 = vpop.permute.xlu0 %333 }
 0x14a   :  { %v1077_v58 = vpop.eup %1076  ;;  %v335_v60 = vrot.slane %v334_v59, 4 }
 0x14b   :  { %338 = vrot.lane.b32.xlu1 %v1077_v58, %s1161_s3 }
 0x1bd   :  { %v339_v61 = vpop.permute.xlu1 %338 }
 0x1be   :  { %v341_v62 = vmul.f32 %v339_v61, %v335_v60 }
 0x1c0   :  { %1040 = vmatmul.msk.f32.vlgmr.msrb.gmra.mxu2 %vm251_vm8, %v341_v62  ;;  %1041 = vmatmul.msk.f32.vlgmr.msrb.gmra.mxu3 %vm251_vm8, %v341_v62 }
 0x1c1   :  { %718 = vmatpush.msrb.mxu2 %v1219_v5  ;;  %738 = vmatpush.msrb.mxu3 %v1210_v3 }
 0x1c3   :  { %719 = vmatpush.msrb.mxu2 %v1242_v10  ;;  %739 = vmatpush.msrb.mxu3 %v1224_v6 }
 0x1c5   :  { %720 = vmatpush.msrb.mxu2 %v1258_v13  ;;  %740 = vmatpush.msrb.mxu3 %v1247_v11 }
 0x1c7   :  { %721 = vmatpush.msrb.mxu2 %v1273_v16  ;;  %741 = vmatpush.msrb.mxu3 %v1264_v14 }
 0x1c9   :  { %722 = vmatpush.msrb.mxu2 %v1289_v19  ;;  %742 = vmatpush.msrb.mxu3 %v1280_v17 }
 0x1cb   :  { %723 = vmatpush.msrb.mxu2 %v1302_v21  ;;  %743 = vmatpush.msrb.mxu3 %v1297_v20 }
 0x1cd   :  { %724 = vmatpush.msrb.mxu2 %v1319_v24  ;;  %744 = vmatpush.msrb.mxu3 %v1314_v23 }
 0x1cf   :  { %725 = vmatpush.msrb.mxu2 %v1331_v26  ;;  %745 = vmatpush.msrb.mxu3 %v1326_v25 }
 0x243   :  { %v383_v63 = vpop.f32.mrf.mxu3  ;;  %v363_v2 = vpop.f32.mrf.mxu2 }
 0x244   :  { %v388_v0 = vrot.slane %v383_v63, 4 }
 0x246   :  { %v389_v4 = vsel %vm157_vm3, %v363_v2, %v388_v0 }
 0x247   :  { %v391_v8 = vadd.f32 %v389_v4, %v1444_v39 }
 0x249   :  { %v1042_v9 = vmul.f32 -1.442695, %v391_v8 }
 0x24b   :  { %1078 = vpow2.f32 %v1042_v9 }
 0x251   :  { %v1079_v12 = vpop.eup %1078 }
 0x252   :  { %v395_v15 = vadd.f32 1.0, %v1079_v12 }
 0x254   :  { %1080 = vrcp.f32 %v395_v15  ;;  %v407_v28 = vand.u32 2147483648, %v395_v15  ;;  %v405_v30 = vand.u32 2147483647, %v395_v15  ;;  %vm401_vm10 = vweird.f32 %v395_v15 }
 0x255   :  { %1082 = vtanh.f32 %v391_v8 }
 0x256   :  { %v408_v34 = vor.u32 1.1754944e-38, %v407_v28  ;;  %vm406_vm12 = vcmp.eq.f32.partialorder %v405_v30, 8.507059e+37 }
 0x25a   :  { %v1081_v18 = vpop.eup %1080 }
 0x25b   :  { %v397_v22 = vmul.f32 %v1081_v18, %v395_v15  ;;  %vm402_vm9 = vweird.f32 %v1081_v18  ;;  %v1083_v31 = vpop.eup %1082 }
 0x25c   :  { %vm403_vm11 = vmor %vm401_vm10, %vm402_vm9  ;;  %v414_v38 = vrot.slane %v1083_v31, 4 }
 0x25d   :  { %v398_v27 = vsub.f32 1.0, %v397_v22 }
 0x25f   :  { %v399_v29 = vmul.f32 %v1081_v18, %v398_v27 }
 0x261   :  { %v400_v32 = vadd.f32 %v1081_v18, %v399_v29 }
 0x263   :  { %v404_v35 = vsel %vm403_vm11, %v1081_v18, %v400_v32 }
 0x264   :  { %v409_v39 = vsel %vm406_vm12, %v408_v34, %v404_v35 }
 0x265   :  { %424 = vrot.lane.b32.xlu2 %v409_v39, %s1161_s3  ;;  %v416_v36 = vmul.f32 %v414_v38, %v409_v39  ;;  %v412_v37 = vmul.f32 %v409_v39, %v330_v57 }
 0x267   :  { %418 = vrot.lane.b32.xlu1 %v416_v36, %s1161_s3 }
 0x2bf   :  { %v425_v40 = vpop.permute.xlu2 %424 }
 0x2c0   :  { %v426_v46 = vrot.slane %v425_v40, 4 }
 0x2d9   :  { %v419_v42 = vpop.permute.xlu1 %418 }
 0x2da   :  { %v421_v43 = vadd.f32 %v419_v42, %v412_v37 }
 0x2dc   :  { %1084 = vtanh.f32 %v421_v43 }
 0x2e2   :  { %v1085_v44 = vpop.eup %1084 }
 0x2e3   :  { %429 = vrot.lane.b32.xlu2 %v1085_v44, %s1161_s3 }
 0x33d   :  { %v430_v47 = vpop.permute.xlu2 %429 }
 0x33e   :  { %v432_v48 = vmul.f32 %v430_v47, %v426_v46 }
 0x340   :  { %1043 = vmatmul.msk.f32.vlgmr.msrb.gmra.mxu0 %vm251_vm8, %v432_v48  ;;  %1044 = vmatmul.msk.f32.vlgmr.msra.gmra.mxu1 %vm251_vm8, %v432_v48 }
 0x341   :  { %809 = vmatpush.msrb.mxu0 %v1219_v5  ;;  %829 = vmatpush.msra.mxu1 %v1210_v3 }
 0x343   :  { %810 = vmatpush.msrb.mxu0 %v1242_v10  ;;  %830 = vmatpush.msra.mxu1 %v1224_v6 }
 0x345   :  { %811 = vmatpush.msrb.mxu0 %v1258_v13  ;;  %831 = vmatpush.msra.mxu1 %v1247_v11 }
 0x347   :  { %812 = vmatpush.msrb.mxu0 %v1273_v16  ;;  %832 = vmatpush.msra.mxu1 %v1264_v14 }
 0x349   :  { %813 = vmatpush.msrb.mxu0 %v1289_v19  ;;  %833 = vmatpush.msra.mxu1 %v1280_v17 }
 0x34b   :  { %814 = vmatpush.msrb.mxu0 %v1302_v21  ;;  %834 = vmatpush.msra.mxu1 %v1297_v20 }
 0x34d   :  { %815 = vmatpush.msrb.mxu0 %v1319_v24  ;;  %835 = vmatpush.msra.mxu1 %v1314_v23 }
 0x34f   :  { %816 = vmatpush.msrb.mxu0 %v1331_v26  ;;  %836 = vmatpush.msra.mxu1 %v1326_v25 }
 0x3bd   :  { %v474_v49 = vpop.f32.mrf.mxu1  ;;  %v454_v51 = vpop.f32.mrf.mxu0 }
 0x3be   :  { %v479_v50 = vrot.slane %v474_v49, 4 }
 0x3c0   :  { %v480_v52 = vsel %vm157_vm3, %v454_v51, %v479_v50 }
 0x3c1   :  { %v482_v53 = vadd.f32 %v480_v52, %v1431_v7 }
 0x3c3   :  { %v1045_v54 = vmul.f32 -1.442695, %v482_v53 }
 0x3c5   :  { %1086 = vpow2.f32 %v1045_v54 }
 0x3cb   :  { %v1087_v55 = vpop.eup %1086 }
 0x3cc   :  { %v486_v56 = vadd.f32 1.0, %v1087_v55 }
 0x3ce   :  { %1088 = vrcp.f32 %v486_v56  ;;  %v498_v60 = vand.u32 2147483648, %v486_v56  ;;  %v496_v62 = vand.u32 2147483647, %v486_v56  ;;  %vm492_vm14 = vweird.f32 %v486_v56 }
 0x3cf   :  { %1090 = vtanh.f32 %v482_v53 }
 0x3d0   :  { %v499_v2 = vor.u32 1.1754944e-38, %v498_v60  ;;  %vm497_vm0 = vcmp.eq.f32.partialorder %v496_v62, 8.507059e+37 }
 0x3d4   :  { %v1089_v57 = vpop.eup %1088 }
 0x3d5   :  { %v488_v58 = vmul.f32 %v1089_v57, %v486_v56  ;;  %vm493_vm13 = vweird.f32 %v1089_v57  ;;  %v1091_v63 = vpop.eup %1090 }
 0x3d6   :  { %vm494_vm15 = vmor %vm492_vm14, %vm493_vm13  ;;  %v505_v7 = vrot.slane %v1091_v63, 4 }
 0x3d7   :  { %v489_v59 = vsub.f32 1.0, %v488_v58 }
 0x3d9   :  { %v490_v61 = vmul.f32 %v1089_v57, %v489_v59 }
 0x3db   :  { %v491_v0 = vadd.f32 %v1089_v57, %v490_v61 }
 0x3dd   :  { %v495_v4 = vsel %vm494_vm15, %v1089_v57, %v491_v0 }
 0x3de   :  { %v500_v8 = vsel %vm497_vm0, %v499_v2, %v495_v4 }
 0x3df   :  { %515 = vrot.lane.b32.xlu1 %v500_v8, %s1161_s3  ;;  %v507_v9 = vmul.f32 %v505_v7, %v500_v8  ;;  %v503_v12 = vmul.f32 %v500_v8, %v421_v43 }
 0x3e1   :  { %509 = vrot.lane.b32.xlu0 %v507_v9, %s1161_s3 }
 0x451   :  { %v516_v27 = vpop.permute.xlu1 %515 }
 0x452   :  { %v517_v28 = vrot.slane %v516_v27, 4 }
 0x453   :  { %v510_v15 = vpop.permute.xlu0 %509 }
 0x454   :  { %v512_v18 = vadd.f32 %v510_v15, %v503_v12 }
 0x456   :  { %1092 = vtanh.f32 %v512_v18 }
 0x45c   :  { %v1093_v22 = vpop.eup %1092 }
 0x45d   :  { %520 = vrot.lane.b32.xlu2 %v1093_v22, %s1161_s3 }
 0x4b7   :  { %v521_v29 = vpop.permute.xlu2 %520 }
 0x4b8   :  { %v523_v30 = vmul.f32 %v521_v29, %v517_v28 }
 0x4ba   :  { %1046 = vmatmul.msk.f32.vlgmr.msra.gmra.mxu2 %vm251_vm8, %v523_v30  ;;  %1047 = vmatmul.msk.f32.vlgmr.msra.gmra.mxu3 %vm251_vm8, %v523_v30 }
 0x4bb   :  { %900 = vmatpush.msra.mxu2 %v1219_v5  ;;  %920 = vmatpush.msra.mxu3 %v1210_v3 }
 0x4bd   :  { %901 = vmatpush.msra.mxu2 %v1242_v10  ;;  %921 = vmatpush.msra.mxu3 %v1224_v6 }
 0x4bf   :  { %902 = vmatpush.msra.mxu2 %v1258_v13  ;;  %922 = vmatpush.msra.mxu3 %v1247_v11 }
 0x4c1   :  { %903 = vmatpush.msra.mxu2 %v1273_v16  ;;  %923 = vmatpush.msra.mxu3 %v1264_v14 }
 0x4c3   :  { %904 = vmatpush.msra.mxu2 %v1289_v19  ;;  %924 = vmatpush.msra.mxu3 %v1280_v17 }
 0x4c5   :  { %905 = vmatpush.msra.mxu2 %v1302_v21  ;;  %925 = vmatpush.msra.mxu3 %v1297_v20 }
 0x4c7   :  { %906 = vmatpush.msra.mxu2 %v1319_v24  ;;  %926 = vmatpush.msra.mxu3 %v1314_v23 }
 0x4c9   :  { %907 = vmatpush.msra.mxu2 %v1331_v26  ;;  %927 = vmatpush.msra.mxu3 %v1326_v25 }
 0x53d   :  { %v565_v3 = vpop.f32.mrf.mxu3  ;;  %v545_v6 = vpop.f32.mrf.mxu2 }
 0x53e   :  { %v570_v5 = vrot.slane %v565_v3, 4 }
 0x540   :  { %v571_v10 = vsel %vm157_vm3, %v545_v6, %v570_v5 }
 0x541   :  { %v573_v11 = vadd.f32 %v571_v10, %v1446_v41 }
 0x543   :  { %v1048_v13 = vmul.f32 -1.442695, %v573_v11 }
 0x545   :  { %1094 = vpow2.f32 %v1048_v13 }
 0x54b   :  { %v1095_v14 = vpop.eup %1094 }
 0x54c   :  { %v577_v16 = vadd.f32 1.0, %v1095_v14 }
 0x54e   :  { %1096 = vrcp.f32 %v577_v16  ;;  %v589_v21 = vand.u32 2147483648, %v577_v16  ;;  %v587_v24 = vand.u32 2147483647, %v577_v16  ;;  %vm583_vm2 = vweird.f32 %v577_v16 }
 0x54f   :  { %1098 = vtanh.f32 %v573_v11 }
 0x550   :  { %v590_v31 = vor.u32 1.1754944e-38, %v589_v21  ;;  %vm588_vm5 = vcmp.eq.f32.partialorder %v587_v24, 8.507059e+37 }
 0x554   :  { %v1097_v17 = vpop.eup %1096 }
 0x555   :  { %v579_v19 = vmul.f32 %v1097_v17, %v577_v16  ;;  %vm584_vm1 = vweird.f32 %v1097_v17  ;;  %v1099_v25 = vpop.eup %1098 }
 0x556   :  { %vm585_vm4 = vmor %vm583_vm2, %vm584_vm1  ;;  %v596_v41 = vrot.slane %v1099_v25, 4 }
 0x557   :  { %v580_v20 = vsub.f32 1.0, %v579_v19 }
 0x559   :  { %v581_v23 = vmul.f32 %v1097_v17, %v580_v20 }
 0x55b   :  { %v582_v26 = vadd.f32 %v1097_v17, %v581_v23 }
 0x55d   :  { %v586_v32 = vsel %vm585_vm4, %v1097_v17, %v582_v26 }
 0x55e   :  { %v591_v34 = vsel %vm588_vm5, %v590_v31, %v586_v32 }
 0x55f   :  { %606 = vrot.lane.b32.xlu1 %v591_v34, %s1161_s3  ;;  %v598_v35 = vmul.f32 %v596_v41, %v591_v34  ;;  %v594_v38 = vmul.f32 %v591_v34, %v512_v18 }
 0x561   :  { %600 = vrot.lane.b32.xlu0 %v598_v35, %s1161_s3 }
 0x5d1   :  { %v607_v42 = vpop.permute.xlu1 %606 }
 0x5d2   :  { %v608_v43 = vrot.slane %v607_v42, 4 }
 0x5d3   :  { %v601_v39 = vpop.permute.xlu0 %600 }
 0x5d4   :  { %v603_v36 = vadd.f32 %v601_v39, %v594_v38 }
 0x5d6   :  { %1100 = vtanh.f32 %v603_v36 }
 0x5dc   :  { %v1101_v37 = vpop.eup %1100 }
 0x5dd   :  { %611 = vrot.lane.b32.xlu2 %v1101_v37, %s1161_s3 }
 0x637   :  { %v612_v44 = vpop.permute.xlu2 %611 }
 0x638   :  { %v614_v40 = vmul.f32 %v612_v44, %v608_v43 }
 0x63a   :  { %1049 = vmatmul.msk.f32.vlgmr.msra.gmra.mxu0 %vm251_vm8, %v614_v40  ;;  %1050 = vmatmul.msk.f32.vlgmr.msrb.gmra.mxu1 %vm251_vm8, %v614_v40 }
 0x6b7   :  { %v656_v46 = vpop.f32.mrf.mxu1  ;;  %v636_v48 = vpop.f32.mrf.mxu0 }
 0x6b8   :  { %v661_v47 = vrot.slane %v656_v46, 4 }
 0x6ba   :  { %v662_v49 = vsel %vm157_vm3, %v636_v48, %v661_v47 }
 0x6bb   :  { %v664_v50 = vadd.f32 %v662_v49, %v1428_v1 }
 0x6bd   :  { %v1051_v51 = vmul.f32 -1.442695, %v664_v50 }
 0x6bf   :  { %1102 = vpow2.f32 %v1051_v51 }
 0x6c5   :  { %v1103_v52 = vpop.eup %1102 }
 0x6c6   :  { %v668_v53 = vadd.f32 1.0, %v1103_v52 }
 0x6c8   :  { %1104 = vrcp.f32 %v668_v53  ;;  %v680_v57 = vand.u32 2147483648, %v668_v53  ;;  %v678_v59 = vand.u32 2147483647, %v668_v53  ;;  %vm674_vm7 = vweird.f32 %v668_v53 }
 0x6c9   :  { %1106 = vtanh.f32 %v664_v50 }
 0x6ca   :  { %v681_v62 = vor.u32 1.1754944e-38, %v680_v57  ;;  %vm679_vm10 = vcmp.eq.f32.partialorder %v678_v59, 8.507059e+37 }
 0x6ce   :  { %v1105_v54 = vpop.eup %1104 }
 0x6cf   :  { %v670_v55 = vmul.f32 %v1105_v54, %v668_v53  ;;  %vm675_vm6 = vweird.f32 %v1105_v54  ;;  %v1107_v60 = vpop.eup %1106 }
 0x6d0   :  { %vm676_vm9 = vmor %vm674_vm7, %vm675_vm6  ;;  %v687_v1 = vrot.slane %v1107_v60, 4 }
 0x6d1   :  { %v671_v56 = vsub.f32 1.0, %v670_v55 }
 0x6d3   :  { %v672_v58 = vmul.f32 %v1105_v54, %v671_v56 }
 0x6d5   :  { %v673_v61 = vadd.f32 %v1105_v54, %v672_v58 }
 0x6d7   :  { %v677_v63 = vsel %vm676_vm9, %v1105_v54, %v673_v61 }
 0x6d8   :  { %v682_v0 = vsel %vm679_vm10, %v681_v62, %v677_v63 }
 0x6d9   :  { %697 = vrot.lane.b32.xlu1 %v682_v0, %s1161_s3  ;;  %v689_v2 = vmul.f32 %v687_v1, %v682_v0  ;;  %v685_v4 = vmul.f32 %v682_v0, %v603_v36 }
 0x6db   :  { %691 = vrot.lane.b32.xlu0 %v689_v2, %s1161_s3 }
 0x74b   :  { %v698_v12 = vpop.permute.xlu1 %697 }
 0x74c   :  { %v699_v15 = vrot.slane %v698_v12, 4 }
 0x74d   :  { %v692_v7 = vpop.permute.xlu0 %691 }
 0x74e   :  { %v694_v8 = vadd.f32 %v692_v7, %v685_v4 }
 0x750   :  { %1108 = vtanh.f32 %v694_v8 }
 0x756   :  { %v1109_v9 = vpop.eup %1108 }
 0x757   :  { %702 = vrot.lane.b32.xlu2 %v1109_v9, %s1161_s3 }
 0x7b1   :  { %v703_v18 = vpop.permute.xlu2 %702 }
 0x7b2   :  { %v705_v22 = vmul.f32 %v703_v18, %v699_v15  ;;  %v230_v15 = vld [vmem:[#allocation1 + $0x1] ss:$2 sm:$0xff] }
 0x7b4   :  { %1052 = vmatmul.msk.f32.vlgmr.msrb.gmra.mxu2 %vm251_vm8, %v705_v22  ;;  %1053 = vmatmul.msk.f32.vlgmr.msrb.gmra.mxu3 %vm251_vm8, %v705_v22 }
 0x837   :  { %v747_v27 = vpop.f32.mrf.mxu3  ;;  %v727_v29 = vpop.f32.mrf.mxu2 }
 0x838   :  { %v752_v28 = vrot.slane %v747_v27, 4 }
 0x83a   :  { %v753_v30 = vsel %vm157_vm3, %v727_v29, %v752_v28 }
 0x83b   :  { %v755_v3 = vadd.f32 %v753_v30, %v1448_v45 }
 0x83d   :  { %v1054_v5 = vmul.f32 -1.442695, %v755_v3 }
 0x83f   :  { %1110 = vpow2.f32 %v1054_v5 }
 0x845   :  { %v1111_v6 = vpop.eup %1110 }
 0x846   :  { %v759_v10 = vadd.f32 1.0, %v1111_v6 }
 0x848   :  { %1112 = vrcp.f32 %v759_v10  ;;  %v771_v16 = vand.u32 2147483648, %v759_v10  ;;  %v769_v19 = vand.u32 2147483647, %v759_v10  ;;  %vm765_vm12 = vweird.f32 %v759_v10 }
 0x849   :  { %1114 = vtanh.f32 %v755_v3 }
 0x84a   :  { %v772_v23 = vor.u32 1.1754944e-38, %v771_v16  ;;  %vm770_vm14 = vcmp.eq.f32.partialorder %v769_v19, 8.507059e+37 }
 0x84e   :  { %v1113_v11 = vpop.eup %1112 }
 0x84f   :  { %v761_v13 = vmul.f32 %v1113_v11, %v759_v10  ;;  %vm766_vm11 = vweird.f32 %v1113_v11  ;;  %v1115_v20 = vpop.eup %1114 }
 0x850   :  { %vm767_vm13 = vmor %vm765_vm12, %vm766_vm11  ;;  %v778_v45 = vrot.slane %v1115_v20, 4 }
 0x851   :  { %v762_v14 = vsub.f32 1.0, %v761_v13 }
 0x853   :  { %v763_v17 = vmul.f32 %v1113_v11, %v762_v14 }
 0x855   :  { %v764_v21 = vadd.f32 %v1113_v11, %v763_v17 }
 0x857   :  { %v768_v24 = vsel %vm767_vm13, %v1113_v11, %v764_v21 }
 0x858   :  { %v773_v25 = vsel %vm770_vm14, %v772_v23, %v768_v24  ;;  %v986_v23 = vld [vmem:[%s1584_s4 + $0x38] sm:$0xff]  ;;  %v985_v24 = vld [vmem:[%s1584_s4 + $0x30] sm:$0xff] }
 0x859   :  { %788 = vrot.lane.b32.xlu1 %v773_v25, %s1161_s3  ;;  %v780_v26 = vmul.f32 %v778_v45, %v773_v25  ;;  %v776_v31 = vmul.f32 %v773_v25, %v694_v8  ;;  %1002 = vmatpush.msra.mxu0 %v986_v23  ;;  %v984_v45 = vld [vmem:[%s1584_s4 + $0x28] sm:$0xff]  ;;  %v983_v25 = vld [vmem:[%s1584_s4 + $0x20] sm:$0xff] }
 0x85b   :  { %782 = vrot.lane.b32.xlu0 %v780_v26, %s1161_s3  ;;  %1003 = vmatpush.msra.mxu0 %v985_v24  ;;  %v982_v26 = vld [vmem:[%s1584_s4 + $0x18] sm:$0xff] }
 0x85d   :  { %1004 = vmatpush.msra.mxu0 %v984_v45 }
 0x85f   :  { %1005 = vmatpush.msra.mxu0 %v983_v25 }
 0x861   :  { %1006 = vmatpush.msra.mxu0 %v982_v26 }
 0x8cb   :  { %v789_v35 = vpop.permute.xlu1 %788 }
 0x8cc   :  { %v790_v38 = vrot.slane %v789_v35, 4 }
 0x8cd   :  { %v783_v32 = vpop.permute.xlu0 %782 }
 0x8ce   :  { %v785_v41 = vadd.f32 %v783_v32, %v776_v31  ;;  %v981_v31 = vld [vmem:[%s1584_s4 + $0x10] sm:$0xff]  ;;  %v980_v32 = vld [vmem:[%s1584_s4 + $0x8] sm:$0xff] }
 0x8cf   :  { %1007 = vmatpush.msra.mxu0 %v981_v31 }
 0x8d0   :  { %1116 = vtanh.f32 %v785_v41 }
 0x8d1   :  { %1008 = vmatpush.msra.mxu0 %v980_v32 }
 0x8d6   :  { %v1117_v34 = vpop.eup %1116 }
 0x8d7   :  { %793 = vrot.lane.b32.xlu2 %v1117_v34, %s1161_s3 }
 0x931   :  { %v794_v39 = vpop.permute.xlu2 %793 }
 0x932   :  { %v796_v36 = vmul.f32 %v794_v39, %v790_v38  ;;  %v979_v39 = vld [vmem:[%s1584_s4] sm:$0xff] }
 0x933   :  { %1009 = vmatpush.msra.mxu0 %v979_v39 }
 0x934   :  { %1055 = vmatmul.msk.f32.vlgmr.msrb.gmra.mxu0 %vm251_vm8, %v796_v36  ;;  %1056 = vmatmul.msk.f32.vlgmr.msra.gmra.mxu1 %vm251_vm8, %v796_v36 }
 0x9b1   :  { %v838_v37 = vpop.f32.mrf.mxu1  ;;  %v818_v43 = vpop.f32.mrf.mxu0 }
 0x9b2   :  { %v843_v42 = vrot.slane %v838_v37, 4 }
 0x9b4   :  { %v844_v44 = vsel %vm157_vm3, %v818_v43, %v843_v42 }
 0x9b5   :  { %v846_v40 = vadd.f32 %v844_v44, %v1441_v33  ;;  %v1069_v44 = vld [vmem:[%s1585_s5] ss:$0 sm:$0xff] }
 0x9b7   :  { %v1057_v46 = vmul.f32 -1.442695, %v846_v40 }
 0x9b9   :  { %1118 = vpow2.f32 %v1057_v46 }
 0x9bf   :  { %v1119_v47 = vpop.eup %1118 }
 0x9c0   :  { %v850_v48 = vadd.f32 1.0, %v1119_v47 }
 0x9c2   :  { %1120 = vrcp.f32 %v850_v48  ;;  %v862_v52 = vand.u32 2147483648, %v850_v48  ;;  %v860_v54 = vand.u32 2147483647, %v850_v48  ;;  %vm856_vm0 = vweird.f32 %v850_v48 }
 0x9c3   :  { %1122 = vtanh.f32 %v846_v40 }
 0x9c4   :  { %v863_v57 = vor.u32 1.1754944e-38, %v862_v52  ;;  %vm861_vm2 = vcmp.eq.f32.partialorder %v860_v54, 8.507059e+37 }
 0x9c8   :  { %v1121_v49 = vpop.eup %1120 }
 0x9c9   :  { %v852_v50 = vmul.f32 %v1121_v49, %v850_v48  ;;  %vm857_vm15 = vweird.f32 %v1121_v49  ;;  %v1123_v55 = vpop.eup %1122 }
 0x9ca   :  { %vm858_vm1 = vmor %vm856_vm0, %vm857_vm15  ;;  %v869_v33 = vrot.slane %v1123_v55, 4 }
 0x9cb   :  { %v853_v51 = vsub.f32 1.0, %v852_v50 }
 0x9cd   :  { %v854_v53 = vmul.f32 %v1121_v49, %v853_v51 }
 0x9cf   :  { %v855_v56 = vadd.f32 %v1121_v49, %v854_v53 }
 0x9d1   :  { %v859_v58 = vsel %vm858_vm1, %v1121_v49, %v855_v56 }
 0x9d2   :  { %v864_v59 = vsel %vm861_vm2, %v863_v57, %v859_v58 }
 0x9d3   :  { %879 = vrot.lane.b32.xlu1 %v864_v59, %s1161_s3  ;;  %v871_v60 = vmul.f32 %v869_v33, %v864_v59  ;;  %v867_v61 = vmul.f32 %v864_v59, %v785_v41 }
 0x9d5   :  { %873 = vrot.lane.b32.xlu0 %v871_v60, %s1161_s3 }
 0xa45   :  { %v880_v0 = vpop.permute.xlu1 %879 }
 0xa46   :  { %v881_v2 = vrot.slane %v880_v0, 4 }
 0xa47   :  { %v874_v62 = vpop.permute.xlu0 %873 }
 0xa48   :  { %v876_v63 = vadd.f32 %v874_v62, %v867_v61 }
 0xa4a   :  { %1124 = vtanh.f32 %v876_v63 }
 0xa50   :  { %v1125_v1 = vpop.eup %1124 }
 0xa51   :  { %884 = vrot.lane.b32.xlu2 %v1125_v1, %s1161_s3 }
 0xaab   :  { %v885_v4 = vpop.permute.xlu2 %884 }
 0xaac   :  { %v887_v7 = vmul.f32 %v885_v4, %v881_v2 }
 0xaae   :  { %1058 = vmatmul.msk.f32.vlgmr.msra.gmra.mxu2 %vm251_vm8, %v887_v7  ;;  %1059 = vmatmul.msk.f32.vlgmr.msra.gmra.mxu3 %vm251_vm8, %v887_v7 }
 0xb31   :  { %v929_v8 = vpop.f32.mrf.mxu3  ;;  %v909_v12 = vpop.f32.mrf.mxu2 }
 0xb32   :  { %v934_v9 = vrot.slane %v929_v8, 4 }
 0xb34   :  { %v935_v18 = vsel %vm157_vm3, %v909_v12, %v934_v9 }
 0xb35   :  { %v937_v22 = vadd.f32 %v935_v18, %v230_v15 }
 0xb37   :  { %v1060_v27 = vmul.f32 -1.442695, %v937_v22 }
 0xb39   :  { %1126 = vpow2.f32 %v1060_v27 }
 0xb3f   :  { %v1127_v28 = vpop.eup %1126 }
 0xb40   :  { %v941_v29 = vadd.f32 1.0, %v1127_v28 }
 0xb42   :  { %1128 = vrcp.f32 %v941_v29  ;;  %v953_v6 = vand.u32 2147483648, %v941_v29  ;;  %v951_v11 = vand.u32 2147483647, %v941_v29  ;;  %vm947_vm5 = vweird.f32 %v941_v29 }
 0xb43   :  { %1130 = vtanh.f32 %v937_v22 }
 0xb44   :  { %v954_v16 = vor.u32 1.1754944e-38, %v953_v6  ;;  %vm952_vm3 = vcmp.eq.f32.partialorder %v951_v11, 8.507059e+37 }
 0xb48   :  { %v1129_v30 = vpop.eup %1128 }
 0xb49   :  { %v943_v3 = vmul.f32 %v1129_v30, %v941_v29  ;;  %vm948_vm4 = vweird.f32 %v1129_v30  ;;  %v1131_v13 = vpop.eup %1130 }
 0xb4a   :  { %vm949_vm6 = vmor %vm947_vm5, %vm948_vm4  ;;  %v960_v19 = vrot.slane %v1131_v13, 4 }
 0xb4b   :  { %v944_v5 = vsub.f32 1.0, %v943_v3 }
 0xb4d   :  { %v945_v10 = vmul.f32 %v1129_v30, %v944_v5 }
 0xb4f   :  { %v946_v14 = vadd.f32 %v1129_v30, %v945_v10 }
 0xb51   :  { %v950_v17 = vsel %vm949_vm6, %v1129_v30, %v946_v14 }
 0xb52   :  { %v955_v20 = vsel %vm952_vm3, %v954_v16, %v950_v17 }
 0xb53   :  { %970 = vrot.lane.b32.xlu1 %v955_v20, %s1161_s3  ;;  %v962_v21 = vmul.f32 %v960_v19, %v955_v20  ;;  %v958_v41 = vmul.f32 %v955_v20, %v876_v63 }
 0xb55   :  { %964 = vrot.lane.b32.xlu0 %v962_v21, %s1161_s3 }
 0xbc5   :  { %v971_v36 = vpop.permute.xlu1 %970 }
 0xbc6   :  { %v972_v37 = vrot.slane %v971_v36, 4 }
 0xbc7   :  { %v965_v34 = vpop.permute.xlu0 %964 }
 0xbc8   :  { %v967_v35 = vadd.f32 %v965_v34, %v958_v41 }
 0xbca   :  { %1132 = vtanh.f32 %v967_v35 }
 0xbd0   :  { %v1133_v38 = vpop.eup %1132 }
 0xbd1   :  { %975 = vrot.lane.b32.xlu2 %v1133_v38, %s1161_s3 }
 0xc2b   :  { %v976_v42 = vpop.permute.xlu2 %975 }
 0xc2c   :  { %v978_v43 = vmul.f32 %v976_v42, %v972_v37 }
 0xc2e   :  { %1061 = vmatmul.msk.f32.vlgmr.msra.gmra.mxu0 %vm251_vm8, %v978_v43 }
 0xcab   :  { %v1011_v40 = vpop.f32.mrf.mxu0 }
 0xcac   :  { %v1012_v46 = vadd.f32 %v1069_v44, %v1011_v40 }
 0xcae   :  { %1014 = vst [vmem:[#allocation3] sm:$0xf] %v1012_v46 }
 0xcaf   :  { %1025 = dma.vmem_to_hbm [thread:$0]  %s1021_s22, 64, %s1023_s25, [#allocation4]  }
 0xcb0   :  { %1158 = dma.done.wait [#allocation4], 64  }
 0xcb1   :  { %1159 = vsyncadd [#allocation4], 4294967232 }
 0xcb2   :  { %1030 = vsyncpa [#allocation4], 1 }

</bundles_post_ra>
